<compile_context>
chip_gen: v5e
topology: v5e:2x2
jax: 0.10.0
libtpu: 0.0.40
codegen_flags: <defaults>
</compile_context>

<pallas_src>
import functools

import numpy as np
import jax
import jax.numpy as jnp
from jax.experimental import pallas as pl
from jax.experimental.pallas import tpu as pltpu

EPS = 1e-5


# ----------------------------------------------------------------------------
# One-time probe of pltpu.roll's rotation convention (run OUTSIDE jit).
# ----------------------------------------------------------------------------
_ROLL_NUMPY_CONVENTION = None


def roll_is_numpy_convention():
    """True if pltpu.roll matches np.roll (out[i] = in[i - shift])."""
    global _ROLL_NUMPY_CONVENTION
    if _ROLL_NUMPY_CONVENTION is None:
        def probe(x_ref, o_ref):
            o_ref[...] = pltpu.roll(x_ref[...], 1, axis=1)

        x = jnp.broadcast_to(jnp.arange(128, dtype=jnp.int32)[None, :], (8, 128))
        out = pl.pallas_call(
            probe, out_shape=jax.ShapeDtypeStruct((8, 128), jnp.int32))(x)
        # np.roll convention: out[:, 1] == in[:, 0] == 0
        _ROLL_NUMPY_CONVENTION = int(out[0, 1]) == 0
    return _ROLL_NUMPY_CONVENTION


# ----------------------------------------------------------------------------
# Fully fused Unet1D kernel.  All activations in flat (C, N*L) layout; level-j
# activations are replicated across 2^j adjacent lanes ("undecimated").
# ----------------------------------------------------------------------------
def _unet1d_kernel(*refs, steps, K, L0, eps, npy_roll):
    x_ref, out_ref = refs[0], refs[-1]
    prm = iter(refs[1:-1])

    NL = x_ref.shape[1]
    pad = K // 2

    # lane index of each flat position inside its own batch element.
    flat = jax.lax.broadcasted_iota(jnp.int32, (1, NL), 1)
    lane = (flat & (L0 - 1)) if (L0 & (L0 - 1)) == 0 else (flat % L0)

    def shift(v, d):
        """s[:, p] = v[:, (p + d) mod NL]; wrapped lanes are masked by callers."""
        amt = ((-d) if npy_roll else d) % NL
        if amt == 0:
            return v
        return pltpu.roll(v, amt, axis=1)

    # Hoisted batch-boundary masks (also give 'same' zero padding at the global
    # ends); cached per flat offset and reused by every conv at that level.
    mask_cache = {}

    def boundary_mask(dd):
        if dd not in mask_cache:
            mask_cache[dd] = jnp.logical_and(lane + dd >= 0, lane + dd < L0)
        return mask_cache[dd]

    def conv(x_list, level):
        """'same' Conv1d at level `level` (lane shifts of d * 2^level).

        x_list: list of (C_i, NL) bf16 values (decoder passes [upsampled, skip],
        which fuses torch.cat(dim=1)).  Weights are tap-major (K, C_out, C_i)
        bf16 refs.  Bias is omitted (cancelled exactly by training-mode BN).
        """
        w_refs = [next(prm) for _ in x_list]
        stride = 1 << level
        acc = None
        for xv, w_ref in zip(x_list, w_refs):
            for k in range(K):
                dd = (k - pad) * stride
                s = shift(xv, dd)
                if dd != 0:
                    s = jnp.where(boundary_mask(dd), s, jnp.zeros_like(s))
                t = jnp.dot(w_ref[k], s, preferred_element_type=jnp.float32)
                acc = t if acc is None else acc + t
        return acc

    def bn_relu(y, out_dtype):
        """Training-mode BatchNorm1d (+ ReLU) on live f32 conv output.

        With the undecimated layout every logical (batch, position) sample
        appears an equal number of times along the lane axis, so lane-axis
        mean/var are exactly the per-channel batch statistics.
        """
        g_ref, be_ref = next(prm), next(prm)
        mean = jnp.mean(y, axis=1, keepdims=True)
        var = jnp.mean((y - mean) * (y - mean), axis=1, keepdims=True)
        yhat = (y - mean) * jax.lax.rsqrt(var + eps)
        return jnp.maximum(g_ref[...] * yhat + be_ref[...], 0.0).astype(out_dtype)

    def block(x_list, level, out_dtype=jnp.bfloat16):
        h = bn_relu(conv(x_list, level), jnp.bfloat16)          # conv1 -> BN1 -> ReLU
        return bn_relu(conv([h], level), out_dtype)             # conv2 -> BN2 -> ReLU

    def max_pool2(y, level):
        """k=2 max-pool: max with the partner half of the next-coarser lane block."""
        s = 1 << level
        up = shift(y, +s)
        dn = shift(y, -s)
        take_up = (lane & s) == 0
        return jnp.maximum(y, jnp.where(take_up, up, dn))

    # ---------------- encoder ----------------
    y = x_ref[...].astype(jnp.bfloat16)          # single bf16 cast of the input
    skips = []
    for i in range(steps):
        y = block([y], level=i)
        skips.append(y)
        y = max_pool2(y, level=i)

    # ---------------- mid block ----------------
    y = block([y], level=steps)

    # ---------------- decoder ----------------
    for i in range(steps):
        lvl = steps - 1 - i
        # F.interpolate(scale_factor=2, mode='nearest') is a NO-OP in the
        # undecimated layout; torch.cat(dim=1) is fused into conv1 (two weight
        # chunks, summed matmuls).
        y = block([y, skips[lvl]], level=lvl,
                  out_dtype=jnp.float32 if lvl == 0 else jnp.bfloat16)

    assert not list(prm), "parameter list / kernel unpack order mismatch"
    out_ref[...] = y


# ----------------------------------------------------------------------------
# One-time parameter re-layout (tap-major bf16 conv weights, column BN params,
# decoder conv1 split along input channels).  Conv biases are not passed.
# ----------------------------------------------------------------------------
def _tap_major(w):
    # (C_out, C_in, K) -> (K, C_out, C_in), bf16 MXU operand
    return jnp.transpose(w, (2, 0, 1)).astype(jnp.bfloat16)


def _col(v):
    return v.reshape(-1, 1).astype(jnp.float32)


def _prep_block(p, split_cat=False):
    if split_cat:
        c_in = p["w1"].shape[1]
        c_up = 2 * c_in // 3          # torch.cat([upsampled, skip], dim=1) boundary
        w1s = [_tap_major(p["w1"][:, :c_up, :]), _tap_major(p["w1"][:, c_up:, :])]
    else:
        w1s = [_tap_major(p["w1"])]
    return w1s + [_col(p["g1"]), _col(p["be1"]),
                  _tap_major(p["w2"]), _col(p["g2"]), _col(p["be2"])]


def prepare_unet_params(params, steps):
    flat = []
    for i in range(steps):
        flat += _prep_block(params["enc"][i])
    flat += _prep_block(params["mid"])
    for i in range(steps):
        flat += _prep_block(params["dec"][i], split_cat=True)
    return flat


# ----------------------------------------------------------------------------
# Unet1D forward: single fused pallas_call, whole arrays resident in VMEM
# (no grid -> no pointless double-buffering of full-array operands).
# ----------------------------------------------------------------------------
def unet1d_forward(flat_params, x, *, steps, kernel_size, out_channels,
                   npy_roll, eps=EPS):
    N, c_in, L0 = x.shape
    assert L0 % (1 << steps) == 0, "length must be divisible by 2**steps"
    NL = N * L0

    xf = jnp.transpose(x, (1, 0, 2)).reshape(c_in, NL)       # flat (C, N*L)

    kernel = functools.partial(_unet1d_kernel, steps=steps, K=kernel_size,
                               L0=L0, eps=eps, npy_roll=npy_roll)
    vmem = pl.BlockSpec(memory_space=pltpu.MemorySpace.VMEM)

    out = pl.pallas_call(
        kernel,
        out_shape=jax.ShapeDtypeStruct((out_channels, NL), jnp.float32),
        in_specs=[vmem] * (1 + len(flat_params)),
        out_specs=vmem,
    )(xf, *flat_params)

    return jnp.transpose(out.reshape(out_channels, N, L0), (1, 0, 2))


# ----------------------------------------------------------------------------
# Pure-JAX reference (NCL layout), same bf16-product / f32-accumulation math,
# biases included (they cancel against training-mode BN in the kernel).
# ----------------------------------------------------------------------------
def _ref_conv_same(x, w, b):
    K = w.shape[-1]
    pad_l = K // 2
    pad_r = K - 1 - pad_l
    y = jax.lax.conv_general_dilated(
        x.astype(jnp.bfloat16), w.astype(jnp.bfloat16),
        window_strides=(1,), padding=[(pad_l, pad_r)],
        dimension_numbers=("NCH", "OIH", "NCH"),
        preferred_element_type=jnp.float32)
    return y + b[None, :, None]


def _ref_bn_relu(y, g, be, eps=EPS):
    mean = jnp.mean(y, axis=(0, 2), keepdims=True)
    var = jnp.mean((y - mean) ** 2, axis=(0, 2), keepdims=True)
    yhat = (y - mean) * jax.lax.rsqrt(var + eps)
    return jnp.maximum(g[None, :, None] * yhat + be[None, :, None], 0.0)


def _ref_block(p, x, eps=EPS):
    h = _ref_bn_relu(_ref_conv_same(x, p["w1"], p["b1"]), p["g1"], p["be1"], eps)
    return _ref_bn_relu(_ref_conv_same(h, p["w2"], p["b2"]), p["g2"], p["be2"], eps)


def unet_forward_ref(params, x, steps):
    skips = []
    y = x
    for i in range(steps):
        y = _ref_block(params["enc"][i], y)
        skips.append(y)
        N, C, L = y.shape
        y = jnp.max(y.reshape(N, C, L // 2, 2), axis=-1)
    y = _ref_block(params["mid"], y)
    for i in range(steps):
        y = jnp.repeat(y, 2, axis=-1)
        y = jnp.concatenate([y, skips[steps - 1 - i]], axis=1)
        y = _ref_block(params["dec"][i], y)
    return y


# ----------------------------------------------------------------------------
# Parameter init mirroring the PyTorch module's structure
# ----------------------------------------------------------------------------
def _init_block(key, c_in, c_out, K):
    ks = jax.random.split(key, 8)

    def conv_init(kw, kb, ci, co):
        bound = 1.0 / np.sqrt(ci * K)
        w = jax.random.uniform(kw, (co, ci, K), jnp.float32, -bound, bound)
        b = jax.random.uniform(kb, (co,), jnp.float32, -bound, bound)
        return w, b

    w1, b1 = conv_init(ks[0], ks[1], c_in, c_out)    # mid_filters == end_filters
    w2, b2 = conv_init(ks[2], ks[3], c_out, c_out)
    g1 = 1.0 + 0.1 * jax.random.normal(ks[4], (c_out,), jnp.float32)
    be1 = 0.1 * jax.random.normal(ks[5], (c_out,), jnp.float32)
    g2 = 1.0 + 0.1 * jax.random.normal(ks[6], (c_out,), jnp.float32)
    be2 = 0.1 * jax.random.normal(ks[7], (c_out,), jnp.float32)
    return dict(w1=w1, b1=b1, g1=g1, be1=be1, w2=w2, b2=b2, g2=g2, be2=be2)


def init_unet_params(key, steps, initial_filters, input_channels, K):
    enc_in = [input_channels] + [initial_filters * 2 ** i for i in range(steps - 1)]
    enc_out = [initial_filters * 2 ** i for i in range(steps)]
    dec_in = [int(initial_filters * (2 ** i * 3)) for i in range(steps)][::-1]
    dec_out = [initial_filters * 2 ** i for i in range(steps)][::-1]

    keys = jax.random.split(key, 2 * steps + 1)
    enc = [_init_block(keys[i], enc_in[i], enc_out[i], K) for i in range(steps)]
    mid = _init_block(keys[steps],
                      initial_filters * 2 ** (steps - 1),
                      initial_filters * 2 ** steps, K)
    dec = [_init_block(keys[steps + 1 + i], dec_in[i], dec_out[i], K)
           for i in range(steps)]
    return dict(enc=enc, mid=mid, dec=dec)


# ----------------------------------------------------------------------------
if __name__ == "__main__":
    STEPS = 3
    INITIAL_FILTERS = 4
    INPUT_CHANNELS = 2
    KERNEL_SIZE = 5          # module default kernel_size
    N, L = 4, 32             # L divisible by 2**STEPS; N*L = 128 lanes at every level

    key = jax.random.PRNGKey(0)
    kp, kx = jax.random.split(key)
    params = init_unet_params(kp, STEPS, INITIAL_FILTERS, INPUT_CHANNELS, KERNEL_SIZE)
    x = jax.random.normal(kx, (N, INPUT_CHANNELS, L), jnp.float32)

    flat_params = prepare_unet_params(params, STEPS)   # one-time weight re-layout
    npy_roll = roll_is_numpy_convention()              # probe once, outside jit

    fwd = jax.jit(functools.partial(
        unet1d_forward, steps=STEPS, kernel_size=KERNEL_SIZE,
        out_channels=INITIAL_FILTERS, npy_roll=npy_roll))

    out = jax.block_until_ready(fwd(flat_params, x))
    assert out.shape == (N, INITIAL_FILTERS, L), out.shape

    ref = unet_forward_ref(params, x, STEPS)
    np.testing.assert_allclose(np.asarray(out), np.asarray(ref), rtol=1e-2, atol=1e-2)

    print("KERNEL_OK")
</pallas_src>

<mosaic_0001>
module attributes {stable_mosaic.version = 11 : i64} {
  func.func @probe(%arg0: memref<8x128xi32, #tpu.memory_space<vmem>>, %arg1: memref<8x128xi32, #tpu.memory_space<vmem>>) attributes {dimension_semantics = [], scalar_prefetch = 0 : i64, scratch_operands = 0 : i64, tpu.core_type = #tpu.core_type<tc>} {
    %c0 = arith.constant 0 : index
    %c0_0 = arith.constant 0 : index
    %0 = vector.load %arg0[%c0, %c0_0] : memref<8x128xi32, #tpu.memory_space<vmem>>, vector<8x128xi32>
    %c1_i32 = arith.constant 1 : i32
    %1 = tpu.dynamic_rotate %0 by %c1_i32 dim 1 : vector<8x128xi32>, i32 -> vector<8x128xi32>
    %c0_1 = arith.constant 0 : index
    %c0_2 = arith.constant 0 : index
    %2 = vector.load %arg1[%c0_1, %c0_2] : memref<8x128xi32, #tpu.memory_space<vmem>>, vector<8x128xi32>
    tpu.vector_store %arg1[%c0_1, %c0_2], %1 {strides = array<i32>} : memref<8x128xi32, #tpu.memory_space<vmem>>, vector<8x128xi32>,
    return
  }
}

</mosaic_0001>

<bundles_post_ra>
// kernel: tpu_custom_call.1
= control target key start
LH: loop header
LB: loop body
LE: loop exit
PB: predicated region body
PF: predicated region fallthrough
CT: control target
= control target key end

     0   :  { %6 = vsyncpa [#allocation3], 0  ;;  %s118_s0 = inlined_call_operand.hbm [shape: s32[8,128], index: 0, kind: input, shape index: {}]   ;;  %s119_s1 = inlined_call_operand.hbm [shape: s32[8,128], index: 1, kind: output, shape index: {}]  }
   0x1   :  { %7 = vsyncpa [#allocation4], 0  ;;  %s13_s8 = sshll.u32 %s118_s0, 4  ;;  %s99_s9 = smov [#allocation2]   ;;  %s14_s8 = int_to_ptr.hbm [resolvable:$true] %s13_s8 }
   0x2   :  { %s15_s10 = sshll.u32 %s99_s9, 4  ;;  %s16_s10 = int_to_ptr.vmem [resolvable:$true] %s15_s10 }
   0x3   :  { %18 = dma.hbm_to_vmem [thread:$0]  %s14_s8, 128, %s16_s10, [#allocation3]  }
   0x4   :  { %95 = dma.done.wait [#allocation3], 128  }
   0x5   :  { %96 = vsyncadd [#allocation3], 4294967168  ;;  %v23_v0 = vld [vmem:[#allocation2] sm:$0xff]  ;;  %s100_s11 = smov 1   ;;  %s101_s12 = smov [#allocation5]  }
   0x6   :  { %24 = vrot.lane.b32.xlu0 %v23_v0, %s100_s11  ;;  %s32_s13 = sshll.u32 %s101_s12, 4  ;;  %s34_s16 = sshll.u32 %s119_s1, 4  ;;  %s33_s13 = int_to_ptr.vmem [resolvable:$true] %s32_s13  ;;  %s35_s16 = int_to_ptr.hbm [resolvable:$true] %s34_s16 }
  0x78   :  { %v25_v1 = vpop.permute.xlu0 %24 }
  0x79   :  { %26 = vst [vmem:[#allocation5] sm:$0xff] %v25_v1 }
  0x7a   :  { %37 = dma.vmem_to_hbm [thread:$0]  %s33_s13, 128, %s35_s16, [#allocation4]  }
  0x7b   :  { %97 = dma.done.wait [#allocation4], 128  }
  0x7c   :  { %98 = vsyncadd [#allocation4], 4294967168 }
  0x7d   :  { %42 = vsyncpa [#allocation3], 1 }
  0x7e   :  { %43 = vsyncpa [#allocation4], 1 }

</bundles_post_ra>
